<compile_context>
chip_gen: v7x
topology: tpu7x:2x2x1
jax: 0.10.0
libtpu: 0.0.40
codegen_flags: <defaults>
</compile_context>

<pallas_src>
import math
from math import pi as PI

import jax
import jax.numpy as jnp
from jax import lax
from jax.experimental import pallas as pl
from jax.experimental.pallas import tpu as pltpu


def _cdiv(a: int, b: int) -> int:
    return -(-a // b)


def _round_up(a: int, m: int) -> int:
    return _cdiv(a, m) * m


def make_bessel_basis(num_radial: int,
                      cutoff: float = 5.0,
                      envelope_exponent: int = 5,
                      max_block_bytes: int = 4 << 20,
                      target_grid_steps: int = 8):
    """Returns (freq_param, apply_fn). apply_fn(dist, freq) -> (E, num_radial)."""
    # Envelope polynomial coefficients baked in as Python literals.
    p = envelope_exponent + 1
    a = -float((p + 1) * (p + 2)) / 2.0
    b = float(p * (p + 2))
    c = -float(p * (p + 1)) / 2.0
    inv_cutoff = 1.0 / float(cutoff)

    R = int(num_radial)
    G = 128 // math.gcd(R, 128)   # edges packed per output row (power of two)
    W = G * R                     # lane width of a packed row (multiple of 128)

    # 0/1 expansion matrix: expand[j, j*R + r] = 1 -> exact lane replication
    # of each edge distance across its R output lanes, done on the MXU.
    expand = (jnp.arange(W, dtype=jnp.int32)[None, :] // R
              == jnp.arange(G, dtype=jnp.int32)[:, None]).astype(jnp.float32)

    # Deterministic parameter init, matching reset_parameters().
    freq = jnp.arange(1, R + 1, dtype=jnp.float32) * PI   # (R,)

    def bessel_kernel(dist_ref, freq_ref, expand_ref, out_ref):
        # dist_ref  : (TR, G)  f32 -- G consecutive edges per packed output row
        # freq_ref  : (1, W)   f32 -- (freq / cutoff) tiled G times along lanes
        # expand_ref: (G, W)   f32 -- 0/1 matrix, expand[j, j*R + r] = 1
        # out_ref   : (TR, W)  f32 -- bit-identical to (TR*G, R) row-major
        d = dist_ref[...]                                     # (TR, G)
        # Replicate each distance across its R lanes on the MXU (exact: 0/1
        # weights; HIGHEST precision keeps the full f32 mantissa).
        d_exp = jnp.dot(d, expand_ref[...],
                        preferred_element_type=jnp.float32,
                        precision=lax.Precision.HIGHEST)      # (TR, W)
        x = d_exp * inv_cutoff
        inv_x = pl.reciprocal(x, approx=False)   # exact; approx=True -> looser tol
        x_pm1 = x ** (p - 1)                     # x^(p-1)
        x_p = x_pm1 * x                          # x^p
        x_pp1 = x_p * x                          # x^(p+1)
        env = inv_x + a * x_pm1 + b * x_p + c * x_pp1
        env = jnp.where(x < 1.0, env, 0.0)
        # TODO(synk): if freq stays frozen at its n*pi init, jnp.sin could be
        # replaced by the sin((n+1)t)=2cos(t)sin(nt)-sin((n-1)t) recurrence to
        # cut VPU work; kept as sin because freq is a trainable Parameter.
        out_ref[...] = env * jnp.sin(freq_ref[...] * d_exp)

    def apply_fn(dist: jax.Array, freq_param: jax.Array) -> jax.Array:
        assert dist.ndim == 1, "dist must be a 1-D tensor of edge distances"
        E = dist.shape[0]

        # Pad only to the packed-row granularity (8 sublanes x G edges/row);
        # tile-sized padding is NOT needed (ragged last block is masked).
        rows = _round_up(_cdiv(E, G), 8)
        e_row = rows * G

        dist32 = dist.astype(jnp.float32)
        if e_row != E:
            # Finite positive pad value; padded entries are sliced off below.
            dist32 = jnp.pad(dist32, (0, e_row - E), constant_values=1.0)
        dist2d = dist32.reshape(rows, G)

        # Tile sizing: <= max_block_bytes per output block (double-buffered it
        # stays well inside v5e's 16 MiB scoped default and v7x's 64 MiB VMEM),
        # and aim for ~target_grid_steps grid steps so the per-step overhead is
        # amortized and v7x's two TensorCores both get "parallel" work.
        max_tile_rows = max(8, (max_block_bytes // (W * 4)) // 8 * 8)
        tile_rows = min(max_tile_rows,
                        _round_up(_cdiv(rows, target_grid_steps), 8))
        n_tiles = _cdiv(rows, tile_rows)

        freq_tiled = jnp.tile(freq_param.astype(jnp.float32) * inv_cutoff,
                              G).reshape(1, W)

        out_packed = pl.pallas_call(
            bessel_kernel,
            out_shape=jax.ShapeDtypeStruct((rows, W), jnp.float32),
            grid_spec=pltpu.PrefetchScalarGridSpec(
                num_scalar_prefetch=0,
                grid=(n_tiles,),
                in_specs=[
                    pl.BlockSpec((tile_rows, G), lambda i: (i, 0)),
                    pl.BlockSpec((1, W), lambda i: (0, 0)),
                    pl.BlockSpec((G, W), lambda i: (0, 0)),
                ],
                out_specs=pl.BlockSpec((tile_rows, W), lambda i: (i, 0)),
            ),
            compiler_params=pltpu.CompilerParams(
                dimension_semantics=("parallel",)),
        )(dist2d, freq_tiled, expand)

        # Zero-cost view: (rows, W) row-major is bit-identical to (rows*G, R).
        out = out_packed.reshape(e_row, R)
        return out if e_row == E else out[:E]

    return freq, apply_fn


def bessel_reference(dist, freq, cutoff, envelope_exponent):
    """Pure-JAX reference mirroring the PyTorch module."""
    p = envelope_exponent + 1
    a = -(p + 1) * (p + 2) / 2.0
    b = p * (p + 2)
    c = -p * (p + 1) / 2.0
    x = dist[:, None] / cutoff
    x_pm1 = x ** (p - 1)
    x_p = x_pm1 * x
    x_pp1 = x_p * x
    env = (1.0 / x + a * x_pm1 + b * x_p + c * x_pp1) * (x < 1.0)
    return env * jnp.sin(freq * x)


if __name__ == "__main__":
    key = jax.random.PRNGKey(0)

    # Two small configs: num_radial=16 (G=8 edges/row, W=128) and the DimeNet++
    # default num_radial=6 (G=64, W=384); E values exercise the ragged tail.
    configs = [
        dict(num_radial=16, cutoff=5.0, envelope_exponent=5, E=300),
        dict(num_radial=6, cutoff=5.0, envelope_exponent=5, E=777),
    ]

    for i, cfg in enumerate(configs):
        k = jax.random.fold_in(key, i)
        # Distances in (0.1, 6.0): strictly positive, some beyond the cutoff so
        # the envelope mask (x < 1) is exercised.
        dist = jax.random.uniform(k, (cfg["E"],), dtype=jnp.float32,
                                  minval=0.1, maxval=6.0)

        freq, apply_fn = make_bessel_basis(cfg["num_radial"], cfg["cutoff"],
                                           cfg["envelope_exponent"])

        out = jax.block_until_ready(apply_fn(dist, freq))
        ref = bessel_reference(dist, freq, cfg["cutoff"],
                               cfg["envelope_exponent"])

        assert out.shape == (cfg["E"], cfg["num_radial"]), out.shape
        assert jnp.allclose(out, ref, atol=2e-4, rtol=2e-4), \
            f"mismatch vs reference in config {i}"

    print("KERNEL_OK")
</pallas_src>

<mosaic_0001>
module attributes {stable_mosaic.version = 11 : i64} {
  func.func @bessel_kernel(%arg0: i32, %arg1: memref<8x8xf32, #tpu.memory_space<vmem>>, %arg2: memref<1x128xf32, #tpu.memory_space<vmem>>, %arg3: memref<8x128xf32, #tpu.memory_space<vmem>>, %arg4: memref<8x128xf32, #tpu.memory_space<vmem>>) attributes {dimension_semantics = [#tpu.dimension_semantics<parallel>], iteration_bounds = array<i64: 5>, scalar_prefetch = 0 : i64, scratch_operands = 0 : i64, tpu.core_type = #tpu.core_type<tc>, window_params = [{transform_indices = @transform_0, window_bounds = array<i64: 8, 8>}, {pipeline_mode = #tpu.pipeline_mode<synchronous>, transform_indices = @transform_1, window_bounds = array<i64: 1, 128>}, {pipeline_mode = #tpu.pipeline_mode<synchronous>, transform_indices = @transform_2, window_bounds = array<i64: 8, 128>}, {transform_indices = @transform_3, window_bounds = array<i64: 8, 128>}]} {
    %c0 = arith.constant 0 : index
    %c0_0 = arith.constant 0 : index
    %0 = vector.load %arg1[%c0, %c0_0] : memref<8x8xf32, #tpu.memory_space<vmem>>, vector<8x8xf32>
    %c0_1 = arith.constant 0 : index
    %c0_2 = arith.constant 0 : index
    %1 = vector.load %arg3[%c0_1, %c0_2] : memref<8x128xf32, #tpu.memory_space<vmem>>, vector<8x128xf32>
    %cst = arith.constant dense<0.000000e+00> : vector<8x128xf32>
    %2 = tpu.matmul %0, %1, %cst {dimension_numbers = #tpu.dot_dimension_numbers<[1], [0], [0], [1], [0, 0, 1, 1], [], []>, precision = #tpu.contract_precision<fp32>} : vector<8x8xf32>, vector<8x128xf32>, vector<8x128xf32> -> vector<8x128xf32>
    %cst_3 = arith.constant 2.000000e-01 : f32
    %3 = vector.broadcast %cst_3 : f32 to vector<8x128xf32>
    %4 = arith.mulf %2, %3 : vector<8x128xf32>
    %5 = tpu.reciprocal %4 : vector<8x128xf32> -> vector<8x128xf32>
    %6 = arith.mulf %4, %4 : vector<8x128xf32>
    %7 = arith.mulf %6, %6 : vector<8x128xf32>
    %8 = arith.mulf %4, %7 : vector<8x128xf32>
    %9 = arith.mulf %8, %4 : vector<8x128xf32>
    %10 = arith.mulf %9, %4 : vector<8x128xf32>
    %cst_4 = arith.constant -2.800000e+01 : f32
    %11 = vector.broadcast %cst_4 : f32 to vector<8x128xf32>
    %12 = arith.mulf %11, %8 : vector<8x128xf32>
    %13 = arith.addf %5, %12 : vector<8x128xf32>
    %cst_5 = arith.constant 4.800000e+01 : f32
    %14 = vector.broadcast %cst_5 : f32 to vector<8x128xf32>
    %15 = arith.mulf %14, %9 : vector<8x128xf32>
    %16 = arith.addf %13, %15 : vector<8x128xf32>
    %cst_6 = arith.constant -2.100000e+01 : f32
    %17 = vector.broadcast %cst_6 : f32 to vector<8x128xf32>
    %18 = arith.mulf %17, %10 : vector<8x128xf32>
    %19 = arith.addf %16, %18 : vector<8x128xf32>
    %cst_7 = arith.constant 1.000000e+00 : f32
    %20 = vector.broadcast %cst_7 : f32 to vector<8x128xf32>
    %21 = arith.cmpf olt, %4, %20 : vector<8x128xf32>
    %cst_8 = arith.constant 0.000000e+00 : f32
    %22 = vector.broadcast %cst_8 : f32 to vector<8x128xf32>
    %23 = arith.select %21, %19, %22 : vector<8x128xi1>, vector<8x128xf32>
    %c0_9 = arith.constant 0 : index
    %c0_10 = arith.constant 0 : index
    %24 = vector.load %arg2[%c0_9, %c0_10] : memref<1x128xf32, #tpu.memory_space<vmem>>, vector<1x128xf32>
    %25 = vector.broadcast %24 : vector<1x128xf32> to vector<8x128xf32>
    %26 = arith.mulf %25, %2 : vector<8x128xf32>
    %27 = math.sin %26 : vector<8x128xf32>
    %28 = arith.mulf %23, %27 : vector<8x128xf32>
    %c0_11 = arith.constant 0 : index
    %c0_12 = arith.constant 0 : index
    %29 = vector.load %arg4[%c0_11, %c0_12] : memref<8x128xf32, #tpu.memory_space<vmem>>, vector<8x128xf32>
    tpu.vector_store %arg4[%c0_11, %c0_12], %28 {strides = array<i32>} : memref<8x128xf32, #tpu.memory_space<vmem>>, vector<8x128xf32>,
    return
  }
  func.func @transform_0(%arg0: i32) -> (i32, i32) {
    %c0_i32 = arith.constant 0 : i32
    %c0_i32_0 = arith.constant 0 : i32
    return %arg0, %c0_i32 : i32, i32
  }
  func.func @transform_1(%arg0: i32) -> (i32, i32) {
    %c0_i32 = arith.constant 0 : i32
    %c0_i32_0 = arith.constant 0 : i32
    %c0_i32_1 = arith.constant 0 : i32
    return %c0_i32, %c0_i32_0 : i32, i32
  }
  func.func @transform_2(%arg0: i32) -> (i32, i32) {
    %c0_i32 = arith.constant 0 : i32
    %c0_i32_0 = arith.constant 0 : i32
    %c0_i32_1 = arith.constant 0 : i32
    return %c0_i32, %c0_i32_0 : i32, i32
  }
  func.func @transform_3(%arg0: i32) -> (i32, i32) {
    %c0_i32 = arith.constant 0 : i32
    %c0_i32_0 = arith.constant 0 : i32
    return %arg0, %c0_i32 : i32, i32
  }
}

</mosaic_0001>

<bundles_post_ra>
// kernel: tpu_custom_call.1
= control target key start
LH: loop header
LB: loop body
LE: loop exit
PB: predicated region body
PF: predicated region fallthrough
CT: control target
= control target key end

     0   :  { %8 = vsyncpa [#allocation3], 0  ;;  %s1173_s0 = inlined_call_operand.vmem [shape: f32[40,8], index: 0, kind: input, shape index: {}]   ;;  %s1174_s1 = inlined_call_operand.vmem [shape: f32[1,128], index: 1, kind: input, shape index: {}]   ;;  %s1175_s2 = inlined_call_operand.vmem [shape: f32[8,128], index: 2, kind: input, shape index: {}]   ;;  %s1176_s3 = inlined_call_operand.hbm [shape: f32[40,128], index: 3, kind: output, shape index: {}]  }
   0x1   :  { %10 = vsyncpa [#allocation3 + $0x1], 0  ;;  %s1036_s12 = smov 0   ;;  %s1038_s13 = smov 0  }
   0x2   :  { %s1040_s14 = smov 0   ;;  %s1042_s15 = smov 0  }
   0x3 LB: > { %s1057_s16 = sadd.s32 4294967295, %s1005_s15   ;;  %s820_s17 = sadd.s32 4294967294, %s1005_s15   ;;  %s1005_s15 = sphi %s1042_s15, %s1182_s15   ;;  %s1001_s14 = sphi %s1040_s14, %s1181_s14   ;;  %s997_s13 = sphi %s1038_s13, %s1180_s13   ;;  %s993_s12 = sphi %s1036_s12, %s1179_s12  }
   0x4   : > { %s1061_s18 = sadd.s32 1, %s1005_s15   ;;  %s91_s19 = sadd.s32 1, %s1001_s14 }
   0x5   : > { %s88_s20 = ssub.s32 %s1005_s15, %s1061_s18  ;;  %p101_p0 = scmp.ne.s32.totalorder %s1001_s14, %s997_s13 }
   0x6   : > { %p89_p1 = scmp.eq.s32.totalorder %s88_s20, 0  ;;  %p102_p2 = scmp.eq.s32.totalorder %s1057_s16, 4 }
   0x7   : > { %p107_p3 = scmp.ne.s32.totalorder %s997_s13, %s993_s12  ;;  %p108_p4 = scmp.eq.s32.totalorder %s820_s17, 4 }
   0x8   : > { %s1072_s21 = scalar_select %p89_p1, %s1001_s14, %s91_s19  }
   0x9   : > { %p1074_p5 = por %p102_p2, %p101_p0  ;;  %p1078_p6 = por %p108_p4, %p107_p3 }
   0xa   : > { %p823_p7 = scmp.ge.s32.totalorder %s1005_s15, 1  ;;  %p139_p8 = scmp.lt.s32.totalorder %s1005_s15, 6 }
   0xc   : > { %p140_p9 = pnand %p823_p7, %p139_p8 }
   0xd   : > { %v167_v0 = vld [vmem:[%s1175_s2] sm:$0xff] (!%p140_p9)  ;;  %p162_p10 = scmp.lt.s32.totalorder (!%p140_p9), %s1057_s16, 4  ;;  %v1007_v1 = vmov (!%p140_p9), 0.0   ;;  %vm1008_vm0 = vmmov (!%p140_p9), 0   ;;  %vm168_vm1 = vcmask (!%p140_p9), 64512   ;;  %s159_s6 = sand.u32 (!%p140_p9), 1, %s997_s13  }
   0xe   : > { %143 = sbr.rel (%p140_p9) target bundleno = 364 (0x16c), region = 32  ;;  %862 = vmatprep.subr.mxu0 (!%p140_p9), %v1007_v1  ;;  %v173_v2 = vand.u32 (!%p140_p9), 4294901760, %v167_v0  ;;  %864 = vmatprep.mubr.msk.f32.mxu0 (!%p140_p9), %vm1008_vm0, %v1007_v1  ;;  %v826_v17 = vld [vmem:[%s1174_s1] ss:$0 sm:$0xff] (!%p140_p9)  ;;  %v1009_v31 = vmov (!%p140_p9), 683565275  }
   0xf   : > { %847 = vmatprep.subr.mxu1 (!%p140_p9), %v1007_v1  ;;  %849 = vmatprep.mubr.msk.f32.mxu1 (!%p140_p9), %vm1008_vm0, %v1007_v1  ;;  %v1010_v33 = vmov (!%p140_p9), 2475754826   ;;  %v1011_v36 = vmov (!%p140_p9), 2131351028   ;;  %v1012_v39 = vmov (!%p140_p9), 2102212464  }
  0x10   : > { %v250_v3 = vsub.f32 (!%p140_p9), %v167_v0, %v173_v2  ;;  %863 = vmatpush3.msra.mxu0 (!%p140_p9), %v173_v2  ;;  %848 = vmatpush3.msra.mxu1 (!%p140_p9), %v173_v2  ;;  %v1013_v42 = vmov (!%p140_p9), 920167782   ;;  %v1014_v45 = vmov (!%p140_p9), 1326507024   ;;  %s824_s7 = sshll.u32 (!%p140_p9), %s159_s6, 3  ;;  %s832_s8 = sshll.u32 (!%p140_p9), %s1057_s16, 7 }
  0x11   : > { %852 = vmatprep.subr.mxu1 (!%p140_p9), %v1007_v1  ;;  %867 = vmatprep.subr.mxu0 (!%p140_p9), %v1007_v1  ;;  %s161_s9 = scalar_lea.vmem (!%p140_p9), [#allocation2], %s824_s7  ;;  %s1131_s19 = scalar_lea.hbm (!%p140_p9), %s1176_s3, %s832_s8 }
  0x12   : > { %v251_v6 = vand.u32 (!%p140_p9), 4294901760, %v250_v3  ;;  %s761_s10 = sshll.u32 (!%p140_p9), %s161_s9, 4  ;;  %s1015_s24 = smov (!%p140_p9), [#allocation2]   ;;  %s1133_s10 = int_to_ptr.vmem [resolvable:$true] %s761_s10 }
  0x13   : > { %s943_s20 = scalar_lea.vmem (!%p140_p9), %s1133_s10, 128  ;;  %s947_s25 = sshll.u32 (!%p140_p9), %s1015_s24, 4  ;;  %s948_s25 = int_to_ptr.vmem [resolvable:$false] %s947_s25 }
  0x14   : > { %v252_v9 = vsub.f32 (!%p140_p9), %v250_v3, %v251_v6  ;;  %p944_p11 = scmp.ne.s32.totalorder (!%p140_p9), %s1133_s10, %s943_s20  ;;  %p950_p0 = scmp.lt.s32.totalorder (!%p140_p9), %s1133_s10, %s948_s25 }
  0x15   : > { %s163_s26 = scalar_select %p162_p10, %s1057_s16, 4 }
  0x16   : > { %v253_v12 = vand.u32 4294901760, %v252_v9  ;;  %s748_s16 = scalar_lea.sflag [#allocation3], %s159_s6  ;;  %p945_p12 = pnand %p944_p11, %p1074_p5 }
  0x17   : > { %s825_s27 = sshll.u32 %s163_s26, 3  ;;  %s949_s26 = scalar_lea.vmem %s948_s25, 256 }
  0x18   : > { %s165_s30 = scalar_lea.vmem %s1173_s0, %s825_s27  ;;  %p946_p13 = pneg %p945_p12 }
  0x19   : > { %v166_v4 = vld [vmem:[%s165_s30] sm:$0xff]  ;;  %p951_p1 = scmp.lt.s32.totalorder %s949_s26, %s943_s20 }
  0x1a   : > { %v170_v5 = vsel %vm168_vm1, %v166_v4, 0 }
  0x1b   : > { %v238_v7 = vand.u32 4294901760, %v170_v5  ;;  %p952_p2 = por %p951_p1, %p950_p0 }
  0x1d   : > { %v239_v8 = vsub.f32 %v170_v5, %v238_v7  ;;  %p953_p3 = pnand %p952_p2, %p946_p13 }
  0x1f   : > { %v240_v10 = vand.u32 4294901760, %v239_v8 }
  0x21   : > { %865 = vmatmul.mubr.f32.vlgmr.msra.gmra.mrb[0].mxu0 %v240_v10  ;;  %v241_v11 = vsub.f32 %v239_v8, %v240_v10 }
  0x22   : > { %868 = vmatpush3.msra.mxu0 %v251_v6  ;;  %869 = vmatprep.mubr.msk.f32.mxu0 %vm1008_vm0, %v1007_v1 }
  0x23   : > { %v242_v13 = vand.u32 4294901760, %v241_v11  ;;  %872 = vmatprep.subr.mxu0 %v1007_v1 }
  0x25   : > { %850 = vmatmul.mubr.f32.vlgmr.msra.gmra.mrb[0].mxu1 %v242_v13 }
  0x26   : > { %853 = vmatpush3.msra.mxu1 %v253_v12  ;;  %854 = vmatprep.mubr.msk.f32.mxu1 %vm1008_vm0, %v1007_v1 }
  0x27   : > { %857 = vmatprep.subr.mxu1 %v1007_v1 }
  0x29   : > { %870 = vmatmul.mubr.f32.vlgmr.msra.gmra.mrb[0].mxu0 %v238_v7 }
  0x2a   : > { %873 = vmatpush3.msra.mxu0 %v173_v2  ;;  %874 = vmatprep.mubr.msk.f32.mxu0 %vm1008_vm0, %v1007_v1 }
  0x2d   : > { %855 = vmatmul.mubr.f32.vlgmr.msra.gmra.mrb[0].mxu1 %v238_v7 }
  0x2e   : > { %858 = vmatpush3.msra.mxu1 %v250_v3  ;;  %859 = vmatprep.mubr.msk.f32.mxu1 %vm1008_vm0, %v1007_v1 }
  0x31   : > { %875 = vmatmul.mubr.f32.vlgmr.msra.gmra.mrb[0].mxu0 %v238_v7 }
  0x35   : > { %860 = vmatmul.mubr.f32.vlgmr.msra.gmra.mrb[0].mxu1 %v239_v8 }
 0x104   : > { %v614_v14 = vpop.f32.mrb[0].mxu0 }
 0x105   : > { %v876_v15 = vpop.f32.mrb[1].mxu0 }
 0x108   : > { %v394_v16 = vpop.f32.mrb[0].mxu1 }
 0x109   : > { %v1101_v18 = vadd.f32 %v614_v14, %v394_v16  ;;  %v861_v19 = vpop.f32.mrb[1].mxu1 }
 0x10b   : > { %v1104_v20 = vmul.f32 %v1101_v18, %v826_v17 }
 0x10d   : > { %v644_v21 = vand.u32 2139095040, %v1104_v20  ;;  %v641_v25 = vand.u32 2147483647, %v1104_v20  ;;  %vm643_vm9 = vcmp.lt.s32.totalorder %v1104_v20, 0  ;;  %vm733_vm15 = vweird.f32 %v1104_v20 }
 0x10f   : > { %v645_v22 = vshrl.u32 %v644_v21, 23  ;;  %v648_v28 = vand.u32 8388607, %v641_v25  ;;  %vm642_vm10 = vcmp.le.f32.partialorder %v641_v25, 0.7853982 }
 0x111   : > { %v827_v23 = vadd.s32 4294967169, %v645_v22  ;;  %v649_v47 = vor.u32 8388608, %v648_v28 }
 0x113   : > { %v651_v24 = vadd.s32 1, %v827_v23  ;;  %v689_v61 = vshll.u32 %v649_v47, 8 }
 0x115   : > { %vm652_vm2 = vcmp.gt.s32.totalorder %v651_v24, 0 }
 0x116   : > { %v653_v26 = vsel %vm652_vm2, %v651_v24, 0 }
 0x117   : > { %v655_v27 = vand.u32 31, %v653_v26  ;;  %v654_v30 = vshrl.u32 %v653_v26, 5  ;;  %v618_v26 = vmul.f32 0.2, %v1101_v18 }
 0x119   : > { %v656_v29 = vsub.s32 32, %v655_v27  ;;  %v658_v32 = vshll.u32 %v1009_v31, %v655_v27  ;;  %v661_v34 = vshll.u32 %v1010_v33, %v655_v27  ;;  %v664_v38 = vshll.u32 %v1011_v36, %v655_v27 }
 0x11a   : > { %v667_v41 = vshll.u32 %v1012_v39, %v655_v27  ;;  %v670_v44 = vshll.u32 %v1013_v42, %v655_v27  ;;  %vm673_vm3 = vcmp.lt.s32.totalorder %v654_v30, 1  ;;  %vm676_vm4 = vcmp.lt.s32.totalorder %v654_v30, 4 }
 0x11b   : > { %v659_v35 = vshrl.u32 %v1010_v33, %v656_v29  ;;  %v662_v37 = vshrl.u32 %v1011_v36, %v656_v29  ;;  %v665_v40 = vshrl.u32 %v1012_v39, %v656_v29  ;;  %v668_v43 = vshrl.u32 %v1013_v42, %v656_v29 }
 0x11c   : > { %v671_v46 = vshrl.u32 %v1014_v45, %v656_v29  ;;  %v657_v56 = vshrl.u32 %v1009_v31, %v656_v29  ;;  %vm675_vm5 = vcmp.lt.s32.totalorder %v654_v30, 3  ;;  %vm674_vm6 = vcmp.lt.s32.totalorder %v654_v30, 2 }
 0x11d   : > { %v660_v48 = vor.u32 %v659_v35, %v658_v32  ;;  %v663_v49 = vor.u32 %v662_v37, %v661_v34  ;;  %v666_v50 = vor.u32 %v665_v40, %v664_v38  ;;  %v669_v51 = vor.u32 %v668_v43, %v667_v41 }
 0x11e   : > { %v672_v52 = vor.u32 %v671_v46, %v670_v44  ;;  %v620_v33 = vmul.f32 %v618_v26, %v618_v26  ;;  %937 = vrcp.f32 %v618_v26  ;;  %vm631_vm14 = vcmp.lt.f32.partialorder %v618_v26, 1.0 }
 0x11f   : > { %v678_v53 = vsel %vm676_vm4, %v666_v50, 2102212464  ;;  %v681_v54 = vsel %vm673_vm3, %v660_v48, %v663_v49  ;;  %v685_v55 = vsel %vm673_vm3, %v663_v49, %v666_v50  ;;  %v682_v57 = vsel %vm676_vm4, %v669_v51, 920167782 }
 0x120   : > { %v686_v58 = vsel %vm676_vm4, %v672_v52, 1326507024  ;;  %v683_v59 = vsel %vm675_vm5, %v666_v50, %v682_v57  ;;  %v677_v62 = vsel %vm673_vm3, %v657_v56, %v660_v48  ;;  %v679_v63 = vsel %vm675_vm5, %v663_v49, %v678_v53 }
 0x121   : > { %v687_v60 = vsel %vm675_vm5, %v669_v51, %v686_v58  ;;  %v684_v0 = vsel %vm674_vm6, %v681_v54, %v683_v59  ;;  %v680_v6 = vsel %vm674_vm6, %v677_v62, %v679_v63  ;;  %v621_v37 = vmul.f32 %v620_v33, %v620_v33 }
 0x122   : > { %v688_v1 = vsel %vm674_vm6, %v685_v55, %v687_v60  ;;  %v1113_v4 = vmul.u32.u64.low %v689_v61, %v684_v0  ;;  %v1114_v5 = vmul.u32.u64.high %v689_v61, %v684_v0, %v1113_v4  ;;  %v696_v8 = vmul.u32 %v689_v61, %v680_v6 }
 0x123   : > { %v1110_v2 = vmul.u32.u64.low %v689_v61, %v688_v1  ;;  %v1111_v3 = vmul.u32.u64.high %v689_v61, %v688_v1, %v1110_v2  ;;  %v622_v40 = vmul.f32 %v621_v37, %v618_v26 }
 0x124   : > { %v699_v7 = vadd.s32 1, %v1114_v5 }
 0x125   : > { %vm698_vm7 = vc.u32 %v1111_v3, %v1113_v4  ;;  %v697_v22 = vadd.s32 %v1113_v4, %v1111_v3  ;;  %v623_v45 = vmul.f32 %v622_v40, %v618_v26  ;;  %v625_v46 = vmul.f32 -28.0, %v622_v40 }
 0x126   : > { %v700_v9 = vsel %vm698_vm7, %v699_v7, %v1114_v5 }
 0x127   : > { %v701_v10 = vadd.s32 %v700_v9, %v696_v8  ;;  %v624_v49 = vmul.f32 %v623_v45, %v618_v26  ;;  %v627_v50 = vmul.f32 48.0, %v623_v45 }
 0x128   : > { %v938_v43 = vpop.eup %937 }
 0x129   : > { %v702_v11 = vadd.s32 536870912, %v701_v10  ;;  %v626_v47 = vadd.f32 %v938_v43, %v625_v46  ;;  %v629_v53 = vmul.f32 -21.0, %v624_v49 }
 0x12b   : > { %v703_v12 = vshrl.u32 %v702_v11, 30  ;;  %v628_v51 = vadd.f32 %v627_v50, %v626_v47 }
 0x12d   : > { %v704_v13 = vshll.u32 %v703_v12, 30  ;;  %v727_v38 = vsub.s32 4, %v703_v12  ;;  %v630_v56 = vadd.f32 %v629_v53, %v628_v51 }
 0x12f   : > { %v705_v14 = vsub.s32 %v701_v10, %v704_v13  ;;  %v728_v41 = vsel %vm643_vm9, %v727_v38, %v703_v12  ;;  %v632_v61 = vsel %vm631_vm14, %v630_v56, 0.0 }
 0x130   : > { %v730_v44 = vsel %vm642_vm10, 0, %v728_v41 }
 0x131   : > { %v707_v15 = vsub.s32 0, %v705_v14  ;;  %v734_v48 = vadd.s32 3, %v730_v44 }
 0x133   : > { %v828_v16 = vmin.u32 %v707_v15, %v705_v14  ;;  %v735_v25 = vand.u32 3, %v734_v48 }
 0x135   : > { %v709_v17 = vclz %v828_v16  ;;  %vm740_vm11 = vcmp.eq.s32.totalorder %v735_v25, 2  ;;  %vm737_vm12 = vcmp.eq.s32.totalorder %v735_v25, 0  ;;  %vm736_vm13 = vcmp.lt.s32.totalorder %v735_v25, 2 }
 0x137   : > { %v829_v19 = vadd.s32 4294967294, %v709_v17 }
 0x139   : > { %vm830_vm8 = vcmp.lt.s32.totalorder %v829_v19, 0 }
 0x13a   : > { %v712_v21 = vsel %vm830_vm8, 0, %v829_v19 }
 0x13b   : > { %v713_v23 = vsub.s32 32, %v712_v21  ;;  %v717_v24 = vsub.s32 4294967266, %v712_v21  ;;  %v714_v27 = vshll.u32 %v705_v14, %v712_v21 }
 0x13d   : > { %v715_v28 = vshrl.u32 %v697_v22, %v713_v23  ;;  %v718_v29 = vadd.s32 127, %v717_v24 }
 0x13f   : > { %v716_v30 = vor.u32 %v715_v28, %v714_v27  ;;  %v719_v31 = vshll.u32 %v718_v29, 23 }
 0x141   : > { %v720_v32 = vor.u32 4788187, %v719_v31  ;;  %v723_v35 = vcvt.s32.f32 %v716_v30 }
 0x143   : > { %v721_v34 = vand.u32 2147483647, %v720_v32 }
 0x145   : > { %v724_v36 = vmul.f32 %v723_v35, %v721_v34 }
 0x147   : > { %v725_v39 = vxor.u32 2147483648, %v724_v36 }
 0x149   : > { %v726_v18 = vsel %vm643_vm9, %v725_v39, %v724_v36 }
 0x14a   : > { %v729_v42 = vsel %vm642_vm10, %v1104_v20, %v726_v18 }
 0x14b   : > { %939 = vcosq.f32 %v729_v42 }
 0x14c   : > { %941 = vsinq.f32 %v729_v42 }
 0x155   : > { %v940_v52 = vpop.eup %939 }
 0x156   : > { %v942_v54 = vpop.eup %941  ;;  %v741_v55 = vxor.u32 2147483648, %v940_v52 }
 0x157   : > { %v738_v57 = vxor.u32 2147483648, %v942_v54 }
 0x158   : > { %v742_v58 = vsel %vm740_vm11, %v741_v55, %v942_v54 }
 0x159   : > { %v739_v59 = vsel %vm737_vm12, %v940_v52, %v738_v57 }
 0x15a   : > { %v743_v60 = vsel %vm736_vm13, %v739_v59, %v742_v58 }
 0x15b   : > { %v744_v62 = vsel %vm733_vm15, nan, %v743_v60 }
 0x15c   : > { %v745_v63 = vmul.f32 %v744_v62, %v632_v61 }
 0x15e   : > { %746 = vst [vmem:[%s161_s9] sm:$0xff] %v745_v63 }
 0x15f   : > { %956 = shalt.err (!%p953_p3)
}
 0x160   : > { %s957_s27 = scalar_lea.hbm %s1131_s19, 128  ;;  %s961_s30 = scalar_lea.hbm %s1176_s3, 640 }
 0x161   : > { %p958_p4 = scmp.ne.s32.totalorder %s1131_s19, %s957_s27  ;;  %p962_p9 = scmp.lt.u32.totalorder %s1131_s19, %s1176_s3 }
 0x162   : > { %p963_p10 = scmp.lt.u32.totalorder %s961_s30, %s957_s27  ;;  %p965_p12 = scmp.lt.u32.totalorder %s957_s27, %s1131_s19 }
 0x163   : > { %p959_p7 = pnand %p958_p4, %p1074_p5 }
 0x164   : > { %p964_p11 = por %p963_p10, %p962_p9 }
 0x165   : > { %p960_p8 = pneg %p959_p7 }
 0x166   : > { %p966_p13 = por %p965_p12, %p964_p11 }
 0x168   : > { %p967_p0 = pnand %p966_p13, %p960_p8 }
 0x16a   : > { %970 = shalt.err (!%p967_p0)
}
 0x16b   : > { %890 = dma.vmem_to_hbm [thread:$0]  (%p1074_p5), %s1133_s10, 128, %s1131_s19, %s748_s16  }
 0x16c PF: > { %p896_p1 = scmp.ge.s32.totalorder %s1005_s15, 2  ;;  %s773_s6 = sand.u32 1, %s993_s12  }
 0x16d   : > { %s774_s7 = scalar_lea.sflag [#allocation3], %s773_s6 }
 0x16e   : > { %p893_p2 = pnand %p896_p1, %p1078_p6 }
 0x170   : > { %988 = dma.done.wait (!%p893_p2), %s774_s7, 128  }
 0x171   : > { %990 = vsyncadd (!%p893_p2), %s774_s7, 4294967168  ;;  %p13_p3 = scmp.ge.s32.totalorder %s1061_s18, 7   ;;  %s1179_s12 = smov %s997_s13 }
 0x172   : > { %s1180_s13 = smov %s1001_s14  ;;  %s1181_s14 = smov %s1072_s21 }
 0x173   : > { %s1182_s15 = smov %s1061_s18  ;;  %15 = sbr.rel (!%p13_p3) target bundleno = 3 (0x3), region = 67 }
 0x17a   :  { %779 = vsyncpa [#allocation3], 1 }
 0x17b   :  { %781 = vsyncpa [#allocation3 + $0x1], 1 }

</bundles_post_ra>
